<compile_context>
chip_gen: v6e
topology: v6e:2x2x1
jax: 0.10.0
libtpu: 0.0.40
codegen_flags: <defaults>
</compile_context>

<pallas_src>
import functools

import jax
import jax.numpy as jnp
from jax.experimental import pallas as pl
from jax.experimental.pallas import tpu as pltpu

LAYER_SIZES = [1, 100, 100, 100, 2]
PAD = 128  # lane width: pad hidden feature dims to this


def _round_up(x, m):
    return (x + m - 1) // m * m


def _pad2d(a, rows, cols):
    r, c = a.shape
    return jnp.pad(a, ((0, rows - r), (0, cols - c)))


def _default_epilogue_dtype():
    """bf16 elementwise epilogue on v6e/v7x (bf16 VALU); f32 on v5e and older."""
    try:
        kind = jax.devices()[0].device_kind.lower().replace(" ", "")
    except Exception:
        return jnp.float32
    if any(tag in kind for tag in ("v2", "v3", "v4", "v5")):
        return jnp.float32
    return jnp.bfloat16


def _mlp_kernel(x_ref,
                w0_ref, b0_ref,
                w1_ref, b1_ref,
                w2_ref, b2_ref,
                w3_ref, b3_ref,
                o_ref):
    """Whole (padded) MLP forward for one batch tile, entirely in VMEM.

    layer 0   : h = relu(x * w0_row + b0)      (VPU broadcast-multiply, K=1, f32)
    layers 1,2: h = relu(h @ W_i + b_i)        (128x128 MXU tiles, f32 accumulate,
                                                epilogue in b_i's dtype: bf16 on v6e/v7x)
    layer 3   : y = (h @ W_3)[:, :out] + b_3   (no activation, narrow 2-lane store)
    """
    out_dim = o_ref.shape[-1]
    cdt = w1_ref.dtype          # MXU operand dtype (bf16 or f32)
    edt = b1_ref.dtype          # elementwise epilogue dtype

    x = x_ref[...].astype(jnp.float32)                       # [bt, 1]

    # Layer 0 + ReLU -- degenerate K=1 matmul done on the VPU (f32, correct on v5e too).
    h = jnp.maximum(x * w0_ref[...] + b0_ref[...], 0.0)      # [bt, 128] f32

    # Layer 1 + ReLU
    h = jnp.dot(h.astype(cdt), w1_ref[...], preferred_element_type=jnp.float32)
    h = jnp.maximum(h.astype(edt) + b1_ref[...], 0.0)        # [bt, 128] edt

    # Layer 2 + ReLU
    h = jnp.dot(h.astype(cdt), w2_ref[...], preferred_element_type=jnp.float32)
    h = jnp.maximum(h.astype(edt) + b2_ref[...], 0.0)        # [bt, 128] edt

    # Layer 3 (final, no activation). Only the first out_dim columns are real.
    y = jnp.dot(h.astype(cdt), w3_ref[...], preferred_element_type=jnp.float32)
    out = y[:, :out_dim] + b3_ref[...]                       # [bt, out_dim] f32

    o_ref[...] = out.astype(o_ref.dtype)


def prepare_params(params, *, compute_dtype=jnp.bfloat16, epilogue_dtype=None):
    """Pad/cast the (W, b) params once, outside the forward path.

    params: list of (W, b) with W: [in, out], b: [1, out] at original sizes.
    Returns the flat tuple of padded arrays consumed by mlp_forward.
    """
    if epilogue_dtype is None:
        epilogue_dtype = _default_epilogue_dtype()

    (w0, b0), (w1, b1), (w2, b2), (w3, b3) = params

    w0_p = _pad2d(w0, 1, PAD).astype(jnp.float32)            # [1, 128]  (VPU layer 0, f32)
    b0_p = _pad2d(b0, 1, PAD).astype(jnp.float32)            # [1, 128]
    w1_p = _pad2d(w1, PAD, PAD).astype(compute_dtype)        # [128, 128]
    b1_p = _pad2d(b1, 1, PAD).astype(epilogue_dtype)         # [1, 128]
    w2_p = _pad2d(w2, PAD, PAD).astype(compute_dtype)        # [128, 128]
    b2_p = _pad2d(b2, 1, PAD).astype(epilogue_dtype)         # [1, 128]
    w3_p = _pad2d(w3, PAD, PAD).astype(compute_dtype)        # [128, 128] (cols 2..127 zero)
    b3_p = b3.astype(jnp.float32)                            # [1, out_dim]  (unpadded)

    return (w0_p, b0_p, w1_p, b1_p, w2_p, b2_p, w3_p, b3_p)


@functools.partial(jax.jit, static_argnames=("batch_tile",))
def mlp_forward(x, flat_params, *, batch_tile=2048):
    """Run the MLP on x: [B, 1] -> [B, out_dim] using pre-padded flat_params."""
    B, in_dim = x.shape
    b3_p = flat_params[-1]
    out_dim = b3_p.shape[1]

    # Batch tile: multiple of 8 (f32 sublane). Keep at least 2 grid steps so the
    # 'parallel' batch axis can shard across both v7x TensorCores.
    bt = min(int(batch_tile), _round_up(pl.cdiv(B, 2), 8))
    bt = max(8, _round_up(bt, 8))
    B_pad = _round_up(B, bt)
    if B_pad // bt < 2:
        B_pad = 2 * bt

    if B_pad != B:
        x = jnp.pad(x, ((0, B_pad - B), (0, 0)))

    # x tiled over the batch; each small weight/bias loaded whole (constant index_map
    # -> no re-DMA across grid steps).
    in_specs = [pl.BlockSpec((bt, in_dim), lambda i: (i, 0))]
    for p in flat_params:
        in_specs.append(pl.BlockSpec(p.shape, lambda i: (0, 0)))

    # Narrow output: last block dim equals the full array dim (out_dim), which is legal
    # and avoids writing 128 padded lanes per row to HBM.
    out_specs = pl.BlockSpec((bt, out_dim), lambda i: (i, 0))

    out = pl.pallas_call(
        _mlp_kernel,
        out_shape=jax.ShapeDtypeStruct((B_pad, out_dim), x.dtype),
        grid_spec=pltpu.PrefetchScalarGridSpec(
            num_scalar_prefetch=0,
            grid=(B_pad // bt,),
            in_specs=in_specs,
            out_specs=out_specs,
        ),
        compiler_params=pltpu.CompilerParams(
            dimension_semantics=("parallel",),
            vmem_limit_bytes=32 * 1024 * 1024,
        ),
    )(x, *flat_params)

    return out[:B]


def init_params(key, layer_sizes=LAYER_SIZES):
    """PyTorch nn.Linear default init: U(-1/sqrt(fan_in), 1/sqrt(fan_in)).

    Returns weights transposed to [in, out] and biases as [1, out] (unpadded).
    """
    params = []
    for i in range(len(layer_sizes) - 1):
        fan_in, fan_out = layer_sizes[i], layer_sizes[i + 1]
        key, kw, kb = jax.random.split(key, 3)
        bound = 1.0 / jnp.sqrt(jnp.float32(fan_in))
        w = jax.random.uniform(kw, (fan_in, fan_out), jnp.float32, -bound, bound)
        b = jax.random.uniform(kb, (1, fan_out), jnp.float32, -bound, bound)
        params.append((w, b))
    return params


def mlp_ref(x, params):
    """Pure-JAX f32 reference for correctness checking."""
    h = x
    for w, b in params[:-1]:
        h = jnp.maximum(h @ w + b, 0.0)
    w, b = params[-1]
    return h @ w + b


if __name__ == "__main__":
    key = jax.random.PRNGKey(0)
    key, kx, kx2 = jax.random.split(key, 3)

    params = init_params(key)

    # --- small batch test (batch=8) ---
    batch = 8
    x = jax.random.normal(kx, (batch, LAYER_SIZES[0]), jnp.float32)
    ref = mlp_ref(x, params)

    # f32 matmul operands + f32 epilogue: tight tolerance vs. reference.
    flat_f32 = prepare_params(params, compute_dtype=jnp.float32,
                              epilogue_dtype=jnp.float32)
    out_f32 = jax.block_until_ready(mlp_forward(x, flat_f32))
    assert out_f32.shape == (batch, LAYER_SIZES[-1]), out_f32.shape
    assert jnp.allclose(out_f32, ref, atol=1e-5, rtol=1e-5), (
        f"f32 max abs err = {jnp.max(jnp.abs(out_f32 - ref))}")

    # Default path: bf16 MXU operands (f32 accumulation), bf16 epilogue on v6e/v7x.
    flat_def = prepare_params(params)
    out_bf16 = jax.block_until_ready(mlp_forward(x, flat_def))
    assert out_bf16.shape == (batch, LAYER_SIZES[-1]), out_bf16.shape
    assert jnp.allclose(out_bf16, ref, atol=5e-2, rtol=5e-2), (
        f"bf16 max abs err = {jnp.max(jnp.abs(out_bf16 - ref))}")

    # --- non-multiple batch test (exercises batch padding + grid > 1) ---
    batch2 = 33
    x2 = jax.random.normal(kx2, (batch2, LAYER_SIZES[0]), jnp.float32)
    ref2 = mlp_ref(x2, params)
    out2 = jax.block_until_ready(mlp_forward(x2, flat_def))
    assert out2.shape == (batch2, LAYER_SIZES[-1]), out2.shape
    assert jnp.allclose(out2, ref2, atol=5e-2, rtol=5e-2), (
        f"bf16 (B=33) max abs err = {jnp.max(jnp.abs(out2 - ref2))}")

    print("KERNEL_OK")
</pallas_src>

<mosaic_0001>
module attributes {stable_mosaic.version = 11 : i64} {
  func.func @_mlp_kernel(%arg0: i32, %arg1: memref<8x1xf32, #tpu.memory_space<vmem>>, %arg2: memref<1x128xf32, #tpu.memory_space<vmem>>, %arg3: memref<1x128xf32, #tpu.memory_space<vmem>>, %arg4: memref<128x128xf32, #tpu.memory_space<vmem>>, %arg5: memref<1x128xf32, #tpu.memory_space<vmem>>, %arg6: memref<128x128xf32, #tpu.memory_space<vmem>>, %arg7: memref<1x128xf32, #tpu.memory_space<vmem>>, %arg8: memref<128x128xf32, #tpu.memory_space<vmem>>, %arg9: memref<1x2xf32, #tpu.memory_space<vmem>>, %arg10: memref<8x2xf32, #tpu.memory_space<vmem>>) attributes {dimension_semantics = [#tpu.dimension_semantics<parallel>], iteration_bounds = array<i64: 2>, scalar_prefetch = 0 : i64, scratch_operands = 0 : i64, tpu.core_type = #tpu.core_type<tc>, window_params = [{transform_indices = @transform_0, window_bounds = array<i64: 8, 1>}, {pipeline_mode = #tpu.pipeline_mode<synchronous>, transform_indices = @transform_1, window_bounds = array<i64: 1, 128>}, {pipeline_mode = #tpu.pipeline_mode<synchronous>, transform_indices = @transform_2, window_bounds = array<i64: 1, 128>}, {pipeline_mode = #tpu.pipeline_mode<synchronous>, transform_indices = @transform_3, window_bounds = array<i64: 128, 128>}, {pipeline_mode = #tpu.pipeline_mode<synchronous>, transform_indices = @transform_4, window_bounds = array<i64: 1, 128>}, {pipeline_mode = #tpu.pipeline_mode<synchronous>, transform_indices = @transform_5, window_bounds = array<i64: 128, 128>}, {pipeline_mode = #tpu.pipeline_mode<synchronous>, transform_indices = @transform_6, window_bounds = array<i64: 1, 128>}, {pipeline_mode = #tpu.pipeline_mode<synchronous>, transform_indices = @transform_7, window_bounds = array<i64: 128, 128>}, {pipeline_mode = #tpu.pipeline_mode<synchronous>, transform_indices = @transform_8, window_bounds = array<i64: 1, 2>}, {transform_indices = @transform_9, window_bounds = array<i64: 8, 2>}]} {
    %c0 = arith.constant 0 : index
    %c0_0 = arith.constant 0 : index
    %0 = vector.load %arg1[%c0, %c0_0] : memref<8x1xf32, #tpu.memory_space<vmem>>, vector<8x1xf32>
    %c0_1 = arith.constant 0 : index
    %c0_2 = arith.constant 0 : index
    %1 = vector.load %arg2[%c0_1, %c0_2] : memref<1x128xf32, #tpu.memory_space<vmem>>, vector<1x128xf32>
    %2 = vector.broadcast %0 : vector<8x1xf32> to vector<8x128xf32>
    %3 = vector.broadcast %1 : vector<1x128xf32> to vector<8x128xf32>
    %4 = arith.mulf %2, %3 : vector<8x128xf32>
    %c0_3 = arith.constant 0 : index
    %c0_4 = arith.constant 0 : index
    %5 = vector.load %arg3[%c0_3, %c0_4] : memref<1x128xf32, #tpu.memory_space<vmem>>, vector<1x128xf32>
    %6 = vector.broadcast %5 : vector<1x128xf32> to vector<8x128xf32>
    %7 = arith.addf %4, %6 : vector<8x128xf32>
    %cst = arith.constant 0.000000e+00 : f32
    %8 = vector.broadcast %cst : f32 to vector<8x128xf32>
    %9 = arith.maximumf %7, %8 : vector<8x128xf32>
    %c0_5 = arith.constant 0 : index
    %c0_6 = arith.constant 0 : index
    %10 = vector.load %arg4[%c0_5, %c0_6] : memref<128x128xf32, #tpu.memory_space<vmem>>, vector<128x128xf32>
    %cst_7 = arith.constant dense<0.000000e+00> : vector<8x128xf32>
    %11 = tpu.matmul %9, %10, %cst_7 {dimension_numbers = #tpu.dot_dimension_numbers<[1], [0], [0], [1], [0, 0, 1, 1], [], []>} : vector<8x128xf32>, vector<128x128xf32>, vector<8x128xf32> -> vector<8x128xf32>
    %c0_8 = arith.constant 0 : index
    %c0_9 = arith.constant 0 : index
    %12 = vector.load %arg5[%c0_8, %c0_9] : memref<1x128xf32, #tpu.memory_space<vmem>>, vector<1x128xf32>
    %13 = vector.broadcast %12 : vector<1x128xf32> to vector<8x128xf32>
    %14 = arith.addf %11, %13 : vector<8x128xf32>
    %cst_10 = arith.constant 0.000000e+00 : f32
    %15 = vector.broadcast %cst_10 : f32 to vector<8x128xf32>
    %16 = arith.maximumf %14, %15 : vector<8x128xf32>
    %c0_11 = arith.constant 0 : index
    %c0_12 = arith.constant 0 : index
    %17 = vector.load %arg6[%c0_11, %c0_12] : memref<128x128xf32, #tpu.memory_space<vmem>>, vector<128x128xf32>
    %cst_13 = arith.constant dense<0.000000e+00> : vector<8x128xf32>
    %18 = tpu.matmul %16, %17, %cst_13 {dimension_numbers = #tpu.dot_dimension_numbers<[1], [0], [0], [1], [0, 0, 1, 1], [], []>} : vector<8x128xf32>, vector<128x128xf32>, vector<8x128xf32> -> vector<8x128xf32>
    %c0_14 = arith.constant 0 : index
    %c0_15 = arith.constant 0 : index
    %19 = vector.load %arg7[%c0_14, %c0_15] : memref<1x128xf32, #tpu.memory_space<vmem>>, vector<1x128xf32>
    %20 = vector.broadcast %19 : vector<1x128xf32> to vector<8x128xf32>
    %21 = arith.addf %18, %20 : vector<8x128xf32>
    %cst_16 = arith.constant 0.000000e+00 : f32
    %22 = vector.broadcast %cst_16 : f32 to vector<8x128xf32>
    %23 = arith.maximumf %21, %22 : vector<8x128xf32>
    %c0_17 = arith.constant 0 : index
    %c0_18 = arith.constant 0 : index
    %24 = vector.load %arg8[%c0_17, %c0_18] : memref<128x128xf32, #tpu.memory_space<vmem>>, vector<128x128xf32>
    %cst_19 = arith.constant dense<0.000000e+00> : vector<8x128xf32>
    %25 = tpu.matmul %23, %24, %cst_19 {dimension_numbers = #tpu.dot_dimension_numbers<[1], [0], [0], [1], [0, 0, 1, 1], [], []>} : vector<8x128xf32>, vector<128x128xf32>, vector<8x128xf32> -> vector<8x128xf32>
    %26 = vector.extract_strided_slice %25 {offsets = [0, 0], sizes = [8, 2], strides = [1, 1]} : vector<8x128xf32> to vector<8x2xf32>
    %c0_20 = arith.constant 0 : index
    %c0_21 = arith.constant 0 : index
    %27 = vector.load %arg9[%c0_20, %c0_21] : memref<1x2xf32, #tpu.memory_space<vmem>>, vector<1x2xf32>
    %28 = vector.broadcast %27 : vector<1x2xf32> to vector<8x2xf32>
    %29 = arith.addf %26, %28 : vector<8x2xf32>
    %c0_22 = arith.constant 0 : index
    %c0_23 = arith.constant 0 : index
    %30 = vector.load %arg10[%c0_22, %c0_23] : memref<8x2xf32, #tpu.memory_space<vmem>>, vector<8x2xf32>
    tpu.vector_store %arg10[%c0_22, %c0_23], %29 {strides = array<i32>} : memref<8x2xf32, #tpu.memory_space<vmem>>, vector<8x2xf32>,
    return
  }
  func.func @transform_0(%arg0: i32) -> (i32, i32) {
    %c0_i32 = arith.constant 0 : i32
    %c0_i32_0 = arith.constant 0 : i32
    return %arg0, %c0_i32 : i32, i32
  }
  func.func @transform_1(%arg0: i32) -> (i32, i32) {
    %c0_i32 = arith.constant 0 : i32
    %c0_i32_0 = arith.constant 0 : i32
    %c0_i32_1 = arith.constant 0 : i32
    return %c0_i32, %c0_i32_0 : i32, i32
  }
  func.func @transform_2(%arg0: i32) -> (i32, i32) {
    %c0_i32 = arith.constant 0 : i32
    %c0_i32_0 = arith.constant 0 : i32
    %c0_i32_1 = arith.constant 0 : i32
    return %c0_i32, %c0_i32_0 : i32, i32
  }
  func.func @transform_3(%arg0: i32) -> (i32, i32) {
    %c0_i32 = arith.constant 0 : i32
    %c0_i32_0 = arith.constant 0 : i32
    %c0_i32_1 = arith.constant 0 : i32
    return %c0_i32, %c0_i32_0 : i32, i32
  }
  func.func @transform_4(%arg0: i32) -> (i32, i32) {
    %c0_i32 = arith.constant 0 : i32
    %c0_i32_0 = arith.constant 0 : i32
    %c0_i32_1 = arith.constant 0 : i32
    return %c0_i32, %c0_i32_0 : i32, i32
  }
  func.func @transform_5(%arg0: i32) -> (i32, i32) {
    %c0_i32 = arith.constant 0 : i32
    %c0_i32_0 = arith.constant 0 : i32
    %c0_i32_1 = arith.constant 0 : i32
    return %c0_i32, %c0_i32_0 : i32, i32
  }
  func.func @transform_6(%arg0: i32) -> (i32, i32) {
    %c0_i32 = arith.constant 0 : i32
    %c0_i32_0 = arith.constant 0 : i32
    %c0_i32_1 = arith.constant 0 : i32
    return %c0_i32, %c0_i32_0 : i32, i32
  }
  func.func @transform_7(%arg0: i32) -> (i32, i32) {
    %c0_i32 = arith.constant 0 : i32
    %c0_i32_0 = arith.constant 0 : i32
    %c0_i32_1 = arith.constant 0 : i32
    return %c0_i32, %c0_i32_0 : i32, i32
  }
  func.func @transform_8(%arg0: i32) -> (i32, i32) {
    %c0_i32 = arith.constant 0 : i32
    %c0_i32_0 = arith.constant 0 : i32
    %c0_i32_1 = arith.constant 0 : i32
    return %c0_i32, %c0_i32_0 : i32, i32
  }
  func.func @transform_9(%arg0: i32) -> (i32, i32) {
    %c0_i32 = arith.constant 0 : i32
    %c0_i32_0 = arith.constant 0 : i32
    return %arg0, %c0_i32 : i32, i32
  }
}

</mosaic_0001>

<bundles_post_ra>
// kernel: mlp_forward.1
= control target key start
LH: loop header
LB: loop body
LE: loop exit
PB: predicated region body
PF: predicated region fallthrough
CT: control target
= control target key end

     0   :  { %14 = vsyncpa [#allocation3], 0  ;;  %s1289_s0 = inlined_call_operand.vmem [shape: f32[16,1], index: 0, kind: input, shape index: {}]   ;;  %s1290_s1 = inlined_call_operand.vmem [shape: f32[1,128], index: 1, kind: input, shape index: {}]   ;;  %s1291_s2 = inlined_call_operand.vmem [shape: f32[1,128], index: 2, kind: input, shape index: {}]   ;;  %s1292_s3 = inlined_call_operand.hbm [shape: f32[128,128], index: 3, kind: input, shape index: {}]   ;;  %s1293_s4 = inlined_call_operand.vmem [shape: f32[1,128], index: 4, kind: input, shape index: {}]   ;;  %s1294_s5 = inlined_call_operand.hbm [shape: f32[128,128], index: 5, kind: input, shape index: {}]   ;;  %s1295_s6 = inlined_call_operand.vmem [shape: f32[1,128], index: 6, kind: input, shape index: {}]   ;;  %s1296_s7 = inlined_call_operand.hbm [shape: f32[128,128], index: 7, kind: input, shape index: {}]   ;;  %s1297_s8 = inlined_call_operand.vmem [shape: f32[1,2], index: 8, kind: input, shape index: {}]   ;;  %s1298_s9 = inlined_call_operand.vmem [shape: f32[16,2], index: 9, kind: output, shape index: {}]  }
   0x1   :  { %15 = vsyncpa [#allocation5], 0  ;;  %s1136_s30 = smov 0  }
   0x2 LB: > { %s1142_s10 = sadd.s32 4294967295, %s1076_s30   ;;  %p765_p0 = scmp.ge.s32.totalorder %s1076_s30, 1  ;;  %s1076_s30 = sphi %s1136_s30, %s21_s30  }
   0x3   : > { %p246_p1 = scmp.lt.s32.totalorder %s1076_s30, 3  ;;  %p961_p2 = scmp.eq.s32.totalorder %s1142_s10, 0 }
   0x4   : > { %s1078_s12 = smov [#allocation4]   ;;  %s1079_s14 = smov [#allocation2]  }
   0x5   : > { %p1147_p3 = pnand %p765_p0, %p246_p1  ;;  %s280_s13 = sshll.u32 %s1078_s12, 4  ;;  %s281_s13 = int_to_ptr.vmem [resolvable:$true] %s280_s13 }
   0x6   : > { %s264_s15 = sshll.u32 %s1079_s14, 4  ;;  %s1080_s17 = smov [#allocation6]   ;;  %s265_s15 = int_to_ptr.vmem [resolvable:$true] %s264_s15 }
   0x7   : > { %p951_p4 = pneg %p1147_p3  ;;  %s296_s18 = sshll.u32 %s1080_s17, 4  ;;  %s1159_s18 = int_to_ptr.vmem [resolvable:$true] %s296_s18 }
   0x8   : > { %s995_s19 = scalar_lea.vmem %s281_s13, 2048  ;;  %p1003_p10 = scmp.lt.s32.totalorder %s281_s13, %s281_s13 }
   0x9   : > { %p1155_p5 = pnand %p961_p2, %p951_p4  ;;  %p996_p7 = scmp.ne.s32.totalorder %s281_s13, %s995_s19 }
   0xa   : > { %p1004_p11 = scmp.lt.s32.totalorder %s995_s19, %s995_s19 }
   0xb   : > { %p986_p6 = pneg %p1155_p5 }
   0xc   : > { %p1005_p12 = por %p1004_p11, %p1003_p10 }
   0xd   : > { %p998_p8 = pnand %p996_p7, %p986_p6 }
   0xf   : > { %p999_p9 = pneg %p998_p8 }
  0x11   : > { %p1006_p13 = pnand %p1005_p12, %p999_p9 }
  0x13   : > { %1009 = shalt.err (!%p1006_p13)
}
  0x14   : > { %s1081_s20 = smov 128   ;;  %s1082_s21 = smov 8  }
  0x15   : > { %957 = dma.hbm_to_vmem [thread:$0]  (!%p1155_p5), %s1294_s5, 2048, %s281_s13, [#allocation5], %s1081_s20, %s1081_s20, %s1082_s21  }
  0x16   : > { %s1021_s24 = scalar_lea.vmem %s265_s15, 2048  ;;  %p1029_p7 = scmp.lt.s32.totalorder %s265_s15, %s265_s15 }
  0x17   : > { %p1022_p0 = scmp.ne.s32.totalorder %s265_s15, %s1021_s24  ;;  %p1030_p8 = scmp.lt.s32.totalorder %s1021_s24, %s1021_s24 }
  0x19   : > { %p1024_p1 = pnand %p1022_p0, %p986_p6  ;;  %p1031_p10 = por %p1030_p8, %p1029_p7 }
  0x1b   : > { %p1025_p4 = pneg %p1024_p1 }
  0x1d   : > { %p1032_p9 = pnand %p1031_p10, %p1025_p4 }
  0x1f   : > { %1035 = shalt.err (!%p1032_p9)
}
  0x20   : > { %954 = dma.hbm_to_vmem [thread:$0]  (!%p1155_p5), %s1292_s3, 2048, %s265_s15, [#allocation3], %s1081_s20, %s1081_s20, %s1082_s21  }
  0x21   : > { %s1047_s27 = scalar_lea.vmem %s1159_s18, 2048  ;;  %p1055_p0 = scmp.lt.s32.totalorder %s1159_s18, %s1159_s18 }
  0x22   : > { %p1048_p11 = scmp.ne.s32.totalorder %s1159_s18, %s1047_s27  ;;  %p1056_p1 = scmp.lt.s32.totalorder %s1047_s27, %s1047_s27 }
  0x24   : > { %p1050_p12 = pnand %p1048_p11, %p986_p6  ;;  %p1057_p4 = por %p1056_p1, %p1055_p0 }
  0x26   : > { %p1051_p13 = pneg %p1050_p12 }
  0x28   : > { %p1058_p7 = pnand %p1057_p4, %p1051_p13 }
  0x2a   : > { %1061 = shalt.err (!%p1058_p7)
}
  0x2b   : > { %960 = dma.hbm_to_vmem [thread:$0]  (!%p1155_p5), %s1296_s7, 2048, %s1159_s18, [#allocation5], %s1081_s20, %s1081_s20, %s1082_s21  }
  0x2c   : > { %322 = sbr.rel (%p1147_p3) target bundleno = 778 (0x30a), region = 56 }
  0x31   : > { %1067 = dma.done.wait (%p961_p2), [#allocation3], 2048  }
  0x32   : > { %1069 = vsyncadd (%p961_p2), [#allocation3], 4294965248 }
  0x33   : > { %1071 = dma.done.wait (%p961_p2), [#allocation5], 4096  }
  0x34   : > { %1073 = vsyncadd (%p961_p2), [#allocation5], 4294963200  ;;  %p364_p6 = scmp.lt.s32.totalorder %s1142_s10, 1  ;;  %v1083_v0 = vmov 0   ;;  %v1084_v1 = vmov 0.0   ;;  %v410_v3 = vld [vmem:[#allocation2 + $0x78] sm:$0xff] }
  0x35   : > { %983 = vset.pattern.permute.xlu0 %v1083_v0  ;;  %834 = vmatprep.subr.mxu0 %v1084_v1  ;;  %v409_v4 = vld [vmem:[#allocation2 + $0x70] sm:$0xff]  ;;  %v408_v5 = vld [vmem:[#allocation2 + $0x68] sm:$0xff]  ;;  %vm1085_vm0 = vmmov 0   ;;  %v407_v6 = vld [vmem:[#allocation2 + $0x60] sm:$0xff]  ;;  %vm677_vm1 = vcmask 15360  }
  0x36   : > { %s1302_s10 = smov (!%p364_p6, %s1142_s10), 1  ;;  %869 = vmatprep.subr.mxu1 %v1084_v1  ;;  %835 = vmatpush3.msra.mxu0 %v410_v3  ;;  %v406_v7 = vld [vmem:[#allocation2 + $0x58] sm:$0xff]  ;;  %v503_v9 = vld [vmem:[#allocation4 + $0x70] sm:$0xff]  ;;  %v502_v11 = vld [vmem:[#allocation4 + $0x68] sm:$0xff] }
  0x37   : > { %s774_s11 = sshll.u32 %s1302_s10, 3  ;;  %836 = vmatprep.subr.mxu0 %v1084_v1  ;;  %866 = vmatprep.mubr.msk.f32.mxu0 %vm1085_vm0, %v1084_v1  ;;  %v504_v8 = vld [vmem:[#allocation4 + $0x78] sm:$0xff]  ;;  %v405_v10 = vld [vmem:[#allocation2 + $0x50] sm:$0xff]  ;;  %v404_v12 = vld [vmem:[#allocation2 + $0x48] sm:$0xff] }
  0x38   : > { %s367_s14 = scalar_lea.vmem %s1289_s0, %s774_s11  ;;  %837 = vmatpush3.msra.mxu0 %v409_v4  ;;  %901 = vmatprep.mubr.msk.f32.mxu1 %vm1085_vm0, %v1084_v1  ;;  %v501_v13 = vld [vmem:[#allocation4 + $0x60] sm:$0xff]  ;;  %v500_v15 = vld [vmem:[#allocation4 + $0x58] sm:$0xff]  ;;  %v499_v17 = vld [vmem:[#allocation4 + $0x50] sm:$0xff]  ;;  %s371_s27 = scalar_lea.vmem %s1298_s9, %s774_s11 }
  0x39   : > { %v372_v2 = vld [vmem:[%s367_s14] sm:$0xff]  ;;  %838 = vmatprep.subr.mxu0 %v1084_v1  ;;  %870 = vmatpush3.msra.mxu1 %v504_v8  ;;  %v402_v16 = vld [vmem:[#allocation2 + $0x38] sm:$0xff]  ;;  %v401_v18 = vld [vmem:[#allocation2 + $0x30] sm:$0xff] }
  0x3a   : > { %376 = vperm.xlu0 %983, %v372_v2   ;;  %839 = vmatpush3.msra.mxu0 %v408_v5  ;;  %v403_v14 = vld [vmem:[#allocation2 + $0x40] sm:$0xff]  ;;  %v498_v19 = vld [vmem:[#allocation4 + $0x48] sm:$0xff]  ;;  %v496_v23 = vld [vmem:[#allocation4 + $0x38] sm:$0xff] }
  0x3b   : > { %840 = vmatprep.subr.mxu0 %v1084_v1  ;;  %871 = vmatprep.subr.mxu1 %v1084_v1  ;;  %v400_v20 = vld [vmem:[#allocation2 + $0x28] sm:$0xff]  ;;  %v497_v21 = vld [vmem:[#allocation4 + $0x40] sm:$0xff]  ;;  %v398_v24 = vld [vmem:[#allocation2 + $0x18] sm:$0xff] }
  0x3c   : > { %841 = vmatpush3.msra.mxu0 %v407_v6  ;;  %872 = vmatpush3.msra.mxu1 %v503_v9  ;;  %v399_v22 = vld [vmem:[#allocation2 + $0x20] sm:$0xff]  ;;  %v495_v25 = vld [vmem:[#allocation4 + $0x30] sm:$0xff]  ;;  %v494_v27 = vld [vmem:[#allocation4 + $0x28] sm:$0xff] }
  0x3d   : > { %842 = vmatprep.subr.mxu0 %v1084_v1  ;;  %873 = vmatprep.subr.mxu1 %v1084_v1  ;;  %v397_v26 = vld [vmem:[#allocation2 + $0x10] sm:$0xff]  ;;  %v396_v28 = vld [vmem:[#allocation2 + $0x8] sm:$0xff]  ;;  %v493_v29 = vld [vmem:[#allocation4 + $0x20] sm:$0xff] }
  0x3e   : > { %843 = vmatpush3.msra.mxu0 %v406_v7  ;;  %874 = vmatpush3.msra.mxu1 %v502_v11  ;;  %v395_v30 = vld [vmem:[#allocation2] sm:$0xff]  ;;  %v492_v31 = vld [vmem:[#allocation4 + $0x18] sm:$0xff]  ;;  %v491_v38 = vld [vmem:[#allocation4 + $0x10] sm:$0xff] }
  0x3f   : > { %844 = vmatprep.subr.mxu0 %v1084_v1  ;;  %875 = vmatprep.subr.mxu1 %v1084_v1  ;;  %v776_v32 = vld [vmem:[%s1290_s1] ss:$0 sm:$0xff]  ;;  %v490_v39 = vld [vmem:[#allocation4 + $0x8] sm:$0xff]  ;;  %v598_v41 = vld [vmem:[#allocation6 + $0x78] sm:$0xff] }
  0x40   : > { %845 = vmatpush3.msra.mxu0 %v405_v10  ;;  %876 = vmatpush3.msra.mxu1 %v501_v13  ;;  %v777_v33 = vld [vmem:[%s1291_s2] ss:$0 sm:$0xff]  ;;  %v597_v42 = vld [vmem:[#allocation6 + $0x70] sm:$0xff]  ;;  %v596_v43 = vld [vmem:[#allocation6 + $0x68] sm:$0xff] }
  0x41   : > { %846 = vmatprep.subr.mxu0 %v1084_v1  ;;  %877 = vmatprep.subr.mxu1 %v1084_v1  ;;  %v489_v40 = vld [vmem:[#allocation4] sm:$0xff]  ;;  %v594_v45 = vld [vmem:[#allocation6 + $0x58] sm:$0xff]  ;;  %v593_v46 = vld [vmem:[#allocation6 + $0x50] sm:$0xff] }
  0x42   : > { %847 = vmatpush3.msra.mxu0 %v404_v12  ;;  %878 = vmatpush3.msra.mxu1 %v500_v15  ;;  %v595_v44 = vld [vmem:[#allocation6 + $0x60] sm:$0xff]  ;;  %v592_v47 = vld [vmem:[#allocation6 + $0x48] sm:$0xff]  ;;  %v590_v49 = vld [vmem:[#allocation6 + $0x38] sm:$0xff] }
  0x43   : > { %848 = vmatprep.subr.mxu0 %v1084_v1  ;;  %879 = vmatprep.subr.mxu1 %v1084_v1  ;;  %v591_v48 = vld [vmem:[#allocation6 + $0x40] sm:$0xff]  ;;  %v589_v50 = vld [vmem:[#allocation6 + $0x30] sm:$0xff]  ;;  %v588_v51 = vld [vmem:[#allocation6 + $0x28] sm:$0xff] }
  0x44   : > { %849 = vmatpush3.msra.mxu0 %v403_v14  ;;  %880 = vmatpush3.msra.mxu1 %v499_v17  ;;  %v587_v52 = vld [vmem:[#allocation6 + $0x20] sm:$0xff]  ;;  %v586_v53 = vld [vmem:[#allocation6 + $0x18] sm:$0xff]  ;;  %v585_v59 = vld [vmem:[#allocation6 + $0x10] sm:$0xff] }
  0x45   : > { %850 = vmatprep.subr.mxu0 %v1084_v1  ;;  %881 = vmatprep.subr.mxu1 %v1084_v1  ;;  %v778_v54 = vld [vmem:[%s1293_s4] ss:$0 sm:$0xff]  ;;  %v584_v60 = vld [vmem:[#allocation6 + $0x8] sm:$0xff] }
  0x46   : > { %851 = vmatpush3.msra.mxu0 %v402_v16  ;;  %882 = vmatpush3.msra.mxu1 %v498_v19  ;;  %v583_v61 = vld [vmem:[#allocation6] sm:$0xff] }
  0x47   : > { %852 = vmatprep.subr.mxu0 %v1084_v1  ;;  %883 = vmatprep.subr.mxu1 %v1084_v1  ;;  %v779_v62 = vld [vmem:[%s1295_s6] ss:$0 sm:$0xff] }
  0x48   : > { %853 = vmatpush3.msra.mxu0 %v401_v18  ;;  %884 = vmatpush3.msra.mxu1 %v497_v21  ;;  %v780_v4 = vld [vmem:[%s1297_s8] ss:$0 sm:$0xff] }
  0x49   : > { %854 = vmatprep.subr.mxu0 %v1084_v1  ;;  %885 = vmatprep.subr.mxu1 %v1084_v1 }
  0x4a   : > { %855 = vmatpush3.msra.mxu0 %v400_v20  ;;  %886 = vmatpush3.msra.mxu1 %v496_v23 }
  0x4b   : > { %856 = vmatprep.subr.mxu0 %v1084_v1  ;;  %887 = vmatprep.subr.mxu1 %v1084_v1 }
  0x4c   : > { %857 = vmatpush3.msra.mxu0 %v399_v22  ;;  %888 = vmatpush3.msra.mxu1 %v495_v25 }
  0x4d   : > { %858 = vmatprep.subr.mxu0 %v1084_v1  ;;  %889 = vmatprep.subr.mxu1 %v1084_v1 }
  0x4e   : > { %859 = vmatpush3.msra.mxu0 %v398_v24  ;;  %890 = vmatpush3.msra.mxu1 %v494_v27 }
  0x4f   : > { %860 = vmatprep.subr.mxu0 %v1084_v1  ;;  %891 = vmatprep.subr.mxu1 %v1084_v1 }
  0x50   : > { %861 = vmatpush3.msra.mxu0 %v397_v26  ;;  %892 = vmatpush3.msra.mxu1 %v493_v29 }
  0x51   : > { %862 = vmatprep.subr.mxu0 %v1084_v1  ;;  %893 = vmatprep.subr.mxu1 %v1084_v1 }
  0x52   : > { %863 = vmatpush3.msra.mxu0 %v396_v28  ;;  %894 = vmatpush3.msra.mxu1 %v492_v31 }
  0x53   : > { %864 = vmatprep.subr.mxu0 %v1084_v1  ;;  %895 = vmatprep.subr.mxu1 %v1084_v1 }
  0x54   : > { %865 = vmatpush3.msra.mxu0 %v395_v30  ;;  %896 = vmatpush3.msra.mxu1 %v491_v38 }
  0x55   : > { %904 = vmatprep.subr.mxu0 %v1084_v1  ;;  %897 = vmatprep.subr.mxu1 %v1084_v1 }
  0x56   : > { %898 = vmatpush3.msra.mxu1 %v490_v39 }
  0x57   : > { %899 = vmatprep.subr.mxu1 %v1084_v1 }
  0x58   : > { %900 = vmatpush3.msra.mxu1 %v489_v40 }
  0xb5   : > { %v377_v34 = vpop.permute.xlu0 %376 }
  0xb6   : > { %v385_v35 = vmul.f32 %v776_v32, %v377_v34 }
  0xb8   : > { %v393_v36 = vadd.f32 %v777_v33, %v385_v35 }
  0xba   : > { %v394_v37 = vmax.f32 %v393_v36, 0.0 }
  0xbc   : > { %867 = vmatmul.mubr.f32.vlgmr.msra.gmra.mxu0 %v394_v37 }
  0xbd   : > { %936 = vmatprep.mubr.msk.f32.mxu0 %vm1085_vm0, %v1084_v1  ;;  %905 = vmatpush3.msra.mxu0 %v598_v41 }
  0xbe   : > { %906 = vmatprep.subr.mxu0 %v1084_v1 }
  0xbf   : > { %907 = vmatpush3.msra.mxu0 %v597_v42 }
  0xc0   : > { %908 = vmatprep.subr.mxu0 %v1084_v1 }
  0xc1   : > { %909 = vmatpush3.msra.mxu0 %v596_v43 }
  0xc2   : > { %910 = vmatprep.subr.mxu0 %v1084_v1 }
  0xc3   : > { %911 = vmatpush3.msra.mxu0 %v595_v44 }
  0xc4   : > { %912 = vmatprep.subr.mxu0 %v1084_v1 }
  0xc5   : > { %913 = vmatpush3.msra.mxu0 %v594_v45 }
  0xc6   : > { %914 = vmatprep.subr.mxu0 %v1084_v1 }
  0xc7   : > { %915 = vmatpush3.msra.mxu0 %v593_v46 }
  0xc8   : > { %916 = vmatprep.subr.mxu0 %v1084_v1 }
  0xc9   : > { %917 = vmatpush3.msra.mxu0 %v592_v47 }
  0xca   : > { %918 = vmatprep.subr.mxu0 %v1084_v1 }
  0xcb   : > { %919 = vmatpush3.msra.mxu0 %v591_v48 }
  0xcc   : > { %920 = vmatprep.subr.mxu0 %v1084_v1 }
  0xcd   : > { %921 = vmatpush3.msra.mxu0 %v590_v49 }
  0xce   : > { %922 = vmatprep.subr.mxu0 %v1084_v1 }
  0xcf   : > { %923 = vmatpush3.msra.mxu0 %v589_v50 }
  0xd0   : > { %924 = vmatprep.subr.mxu0 %v1084_v1 }
  0xd1   : > { %925 = vmatpush3.msra.mxu0 %v588_v51 }
  0xd2   : > { %926 = vmatprep.subr.mxu0 %v1084_v1 }
  0xd3   : > { %927 = vmatpush3.msra.mxu0 %v587_v52 }
  0xd4   : > { %928 = vmatprep.subr.mxu0 %v1084_v1 }
  0xd5   : > { %929 = vmatpush3.msra.mxu0 %v586_v53 }
  0xd6   : > { %930 = vmatprep.subr.mxu0 %v1084_v1 }
  0xd7   : > { %931 = vmatpush3.msra.mxu0 %v585_v59 }
  0xd8   : > { %932 = vmatprep.subr.mxu0 %v1084_v1 }
  0xd9   : > { %933 = vmatpush3.msra.mxu0 %v584_v60 }
  0xda   : > { %934 = vmatprep.subr.mxu0 %v1084_v1 }
  0xdb   : > { %935 = vmatpush3.msra.mxu0 %v583_v61 }
 0x17c   : > { %v484_v55 = vpop.f32.mrf.mxu0 }
 0x17d   : > { %v485_v56 = vadd.f32 %v778_v54, %v484_v55 }
 0x17e   : > { %v868_v57 = vpop.f32.mrf.mxu0 }
 0x17f   : > { %v488_v58 = vmax.f32 %v485_v56, 0.0 }
 0x181   : > { %902 = vmatmul.mubr.f32.vlgmr.msra.gmra.mxu1 %v488_v58 }
 0x241   : > { %v578_v63 = vpop.f32.mrf.mxu1 }
 0x242   : > { %v579_v0 = vadd.f32 %v779_v62, %v578_v63 }
 0x243   : > { %v903_v2 = vpop.f32.mrf.mxu1 }
 0x244   : > { %v582_v3 = vmax.f32 %v579_v0, 0.0 }
 0x246   : > { %937 = vmatmul.mubr.f32.vlgmr.msra.gmra.mxu0 %v582_v3 }
 0x306   : > { %v665_v1 = vpop.f32.mrf.mxu0 }
 0x307   : > { %v676_v5 = vadd.f32 %v780_v4, %v665_v1 }
 0x308   : > { %v938_v6 = vpop.f32.mrf.mxu0 }
 0x309   : > { %678 = vst.msk [vmem:[%s371_s27] sm:$0xff] %vm677_vm1, %v676_v5 }
 0x30a PF: > { %s21_s30 = sadd.s32 1, %s1076_s30  }
 0x30b   : > { %p18_p2 = scmp.ge.s32.totalorder %s21_s30, 4  }
 0x30d   :  { %20 = sbr.rel (!%p18_p2) target bundleno = 2 (0x2), region = 99 }
 0x312   :  { %698 = vsyncpa [#allocation3], 1 }
 0x313   :  { %700 = vsyncpa [#allocation3 + $0x1], 1 }
 0x314   :  { %701 = vsyncpa [#allocation5], 1 }

</bundles_post_ra>
